<compile_context>
chip_gen: v7x
topology: tpu7x:2x2x1
jax: 0.10.0
libtpu: 0.0.40
codegen_flags: <defaults>
</compile_context>

<pallas_src>
import numpy as np
import jax
import jax.numpy as jnp
from jax.experimental import pallas as pl
from jax.experimental.pallas import tpu as pltpu


def _round_up(x, m):
    return (x + m - 1) // m * m


def gate_onehot_kernel(cidx_ref, o_ref):
    """Emit one-hot rows: o[m, c] = (c == cidx[m]).  Pure VPU, no MXU.

    The column iota is a single (1, C_pad) vreg row; the compare broadcasts it
    against the [TM, 1] index column, so no TM x C_pad int32 intermediate."""
    cidx = cidx_ref[...]                                        # [TM, 1] int32
    cpad = o_ref.shape[1]
    col = jax.lax.broadcasted_iota(jnp.int32, (1, cpad), 1)     # [1, C_pad]
    o_ref[...] = (col == cidx).astype(o_ref.dtype)              # [TM, C_pad]


def _tm_max_for_device():
    """Bigger tiles on v7x (3.2 TB/s HBM needs more bytes/step); ~2048 else."""
    try:
        kind = jax.devices()[0].device_kind.lower()
    except Exception:
        return 2048
    if "v7" in kind:
        return 4096
    return 2048


def elemental_gate_2p_forward(atomic_numbers, raw_to_compact_lut, npairs,
                              out_dtype=jnp.float32, unpad=True, tm_max=None):
    """Pallas implementation of ElementalGate2P.forward.

    atomic_numbers:      integer array of arbitrary shape (raw pair-id IDs).
    raw_to_compact_lut:  int32 [maxpair] mapping raw pair-id -> compact column
                         (-1 for rows with no pair -> all-zero output row).
    npairs:              number of unique element pairs (output channels).
    out_dtype:           output dtype (float32 default; bf16 halves HBM writes).
    unpad:               True  -> return atomic_numbers.shape + (npairs,)
                                  (exact module semantics; extra slice pass).
                         False -> return the padded (M_pad, C_pad) slab so a
                                  fused consumer avoids the second HBM pass.
    """
    orig_shape = atomic_numbers.shape
    idx_flat = atomic_numbers.reshape(-1).astype(jnp.int32)
    M = int(idx_flat.shape[0])

    # Compact-column lookup (tiny gather, stays in plain XLA).
    cidx = raw_to_compact_lut[idx_flat]                         # [M] int32

    # Lane-dense output width (multiple of 128).
    npairs = int(npairs)
    C_pad = _round_up(max(npairs, 1), 128)

    if tm_max is None:
        tm_max = _tm_max_for_device()

    # Tile over M.  Guarantee >=2 grid steps whenever M spans more than one
    # 8-row block (so both v7x TensorCores get work), while keeping tiles big
    # enough that the ~0.35 us/step pipeline overhead is amortized.  Padded
    # rows get sentinel -1 -> all-zero rows; waste is bounded by TM-1 rows.
    M_pad8 = _round_up(max(M, 8), 8)
    if M_pad8 <= 8:
        TM = 8
    else:
        TM = min(int(tm_max), _round_up(pl.cdiv(M_pad8, 2), 8))
    M_pad = _round_up(M_pad8, TM)
    grid_m = M_pad // TM

    cidx_p = jnp.full((M_pad, 1), -1, jnp.int32).at[:M, 0].set(cidx)

    out_itemsize = jnp.dtype(out_dtype).itemsize
    # Honest VMEM accounting: the (TM, 1) int32 index block is lane-padded to
    # TM x 128 words in VMEM; double-buffer (index tile + output tile) + 2 MiB
    # headroom for compiler scratch.
    per_buffer = TM * C_pad * out_itemsize + TM * 128 * 4
    vmem_bytes = int(2 * per_buffer + (2 << 20))

    cost = pl.CostEstimate(
        flops=2 * M_pad * C_pad,
        transcendentals=0,
        bytes_accessed=M_pad * C_pad * out_itemsize + M_pad * 4,
    )

    out = pl.pallas_call(
        gate_onehot_kernel,
        out_shape=jax.ShapeDtypeStruct((M_pad, C_pad), out_dtype),
        grid=(grid_m,),
        in_specs=[pl.BlockSpec((TM, 1), lambda i: (i, 0))],
        out_specs=pl.BlockSpec((TM, C_pad), lambda i: (i, 0)),
        compiler_params=pltpu.CompilerParams(
            dimension_semantics=("parallel",),
            vmem_limit_bytes=vmem_bytes),
        cost_estimate=cost,
    )(cidx_p)

    if not unpad:
        return out                                   # padded slab for fused consumers

    if M_pad != M or C_pad != npairs:
        out = out[:M, :npairs]
    return out.reshape(*orig_shape, npairs)


def build_gate(elements):
    """Deterministically rebuild the frozen gate (onehot=True, trainable=False):
    the one-hot weight table (reference checking only) and the compact LUT the
    kernel path actually uses.  Done once at init; nothing here is per-call."""
    elements = sorted(elements)
    nelems = len(elements)
    npairs = int(nelems * (nelems + 1) / 2)
    maxelem = int(max(elements) + 1)

    # pairmat: symmetric matrix assigning a unique raw pair-id to each element
    # pair (Zi <= Zj); id chosen as Zi * maxelem + Zj.
    pairmat = np.zeros((maxelem, maxelem), dtype=np.int64)
    pairs = []
    for i, Zi in enumerate(elements):
        for Zj in elements[i:]:
            pid = Zi * maxelem + Zj
            pairmat[Zi, Zj] = pid
            pairmat[Zj, Zi] = pid
            pairs.append(pid)

    maxpair = int(np.max(pairmat) + 1)
    weights = np.zeros((maxpair, npairs), dtype=np.float32)     # reference only
    lut = np.full((maxpair,), -1, dtype=np.int32)               # raw id -> column
    for idx, Z in enumerate(pairs):
        weights[Z, idx] = 1.0
        lut[Z] = idx
    return (jnp.asarray(weights), jnp.asarray(lut),
            np.asarray(pairs, dtype=np.int32), npairs)


if __name__ == "__main__":
    # Small synthetic setup: 4 element types -> 10 unique pairs.
    elements = [1, 6, 7, 8]
    gate_weight, lut, pairs, npairs = build_gate(elements)      # weight: [81, 10]

    # atomic_numbers: [batch=2, seq=8] valid raw pair-ids drawn deterministically.
    key = jax.random.PRNGKey(0)
    sel = jax.random.randint(key, (2, 8), 0, npairs)
    atomic_numbers = jnp.asarray(pairs)[sel]                    # [2, 8] int32

    out = elemental_gate_2p_forward(atomic_numbers, lut, npairs)
    out = jax.block_until_ready(out)

    # Reference: plain embedding lookup on the frozen one-hot table.
    ref = jnp.take(gate_weight, atomic_numbers, axis=0)
    assert out.shape == (2, 8, npairs), out.shape
    assert np.allclose(np.asarray(out), np.asarray(ref)), "mismatch vs reference"

    # Also exercise the fused-consumer path (padded slab, no post-kernel slice).
    out_padded = jax.block_until_ready(
        elemental_gate_2p_forward(atomic_numbers, lut, npairs, unpad=False))
    assert out_padded.shape[1] % 128 == 0 and out_padded.shape[0] % 8 == 0
    assert np.allclose(np.asarray(out_padded[:16, :npairs]),
                       np.asarray(ref.reshape(16, npairs))), "padded path mismatch"

    print("KERNEL_OK")
</pallas_src>

<mosaic_0001>
module attributes {stable_mosaic.version = 11 : i64} {
  func.func @gate_onehot_kernel(%arg0: i32, %arg1: memref<8x1xi32, #tpu.memory_space<vmem>>, %arg2: memref<8x128xf32, #tpu.memory_space<vmem>>) attributes {dimension_semantics = [#tpu.dimension_semantics<parallel>], iteration_bounds = array<i64: 2>, scalar_prefetch = 0 : i64, scratch_operands = 0 : i64, tpu.core_type = #tpu.core_type<tc>, window_params = [{transform_indices = @transform_0, window_bounds = array<i64: 8, 1>}, {transform_indices = @transform_1, window_bounds = array<i64: 8, 128>}]} {
    %c0 = arith.constant 0 : index
    %c0_0 = arith.constant 0 : index
    %0 = vector.load %arg1[%c0, %c0_0] : memref<8x1xi32, #tpu.memory_space<vmem>>, vector<8x1xi32>
    %1 = tpu.iota {dimensions = array<i32: 1>} : vector<1x128xi32>
    %2 = vector.broadcast %1 : vector<1x128xi32> to vector<8x128xi32>
    %3 = vector.broadcast %0 : vector<8x1xi32> to vector<8x128xi32>
    %4 = arith.cmpi eq, %2, %3 : vector<8x128xi32>
    %5 = arith.extui %4 : vector<8x128xi1> to vector<8x128xi32>
    %6 = arith.sitofp %5 : vector<8x128xi32> to vector<8x128xf32>
    %c0_1 = arith.constant 0 : index
    %c0_2 = arith.constant 0 : index
    %7 = vector.load %arg2[%c0_1, %c0_2] : memref<8x128xf32, #tpu.memory_space<vmem>>, vector<8x128xf32>
    tpu.vector_store %arg2[%c0_1, %c0_2], %6 {strides = array<i32>} : memref<8x128xf32, #tpu.memory_space<vmem>>, vector<8x128xf32>,
    return
  }
  func.func @transform_0(%arg0: i32) -> (i32, i32) {
    %c0_i32 = arith.constant 0 : i32
    %c0_i32_0 = arith.constant 0 : i32
    return %arg0, %c0_i32 : i32, i32
  }
  func.func @transform_1(%arg0: i32) -> (i32, i32) {
    %c0_i32 = arith.constant 0 : i32
    %c0_i32_0 = arith.constant 0 : i32
    return %arg0, %c0_i32 : i32, i32
  }
}

</mosaic_0001>

<bundles_post_ra>
// kernel: tpu_custom_call.1
= control target key start
LH: loop header
LB: loop body
LE: loop exit
PB: predicated region body
PF: predicated region fallthrough
CT: control target
= control target key end

     0   :  { %6 = vsyncpa [#allocation3], 0  ;;  %s425_s0 = inlined_call_operand.vmem [shape: s32[16,1], index: 0, kind: input, shape index: {}]   ;;  %s426_s1 = inlined_call_operand.hbm [shape: f32[16,128], index: 1, kind: output, shape index: {}]  }
   0x1   :  { %8 = vsyncpa [#allocation3 + $0x1], 0  ;;  %s325_s6 = smov 0   ;;  %s327_s7 = smov 0  }
   0x2   :  { %s329_s8 = smov 0   ;;  %s331_s9 = smov 0  }
   0x3 LB: > { %s346_s10 = sadd.s32 4294967295, %s310_s9   ;;  %s195_s11 = sadd.s32 4294967294, %s310_s9   ;;  %s310_s9 = sphi %s331_s9, %s432_s9   ;;  %s306_s8 = sphi %s329_s8, %s431_s8   ;;  %s302_s7 = sphi %s327_s7, %s430_s7   ;;  %s298_s6 = sphi %s325_s6, %s429_s6  }
   0x4   : > { %s350_s12 = sadd.s32 1, %s310_s9   ;;  %s47_s13 = sadd.s32 1, %s306_s8 }
   0x5   : > { %s44_s14 = ssub.s32 %s310_s9, %s350_s12  ;;  %p57_p0 = scmp.ne.s32.totalorder %s306_s8, %s302_s7 }
   0x6   : > { %p45_p1 = scmp.eq.s32.totalorder %s44_s14, 0  ;;  %p58_p2 = scmp.eq.s32.totalorder %s346_s10, 1 }
   0x7   : > { %p63_p3 = scmp.ne.s32.totalorder %s302_s7, %s298_s6  ;;  %p64_p4 = scmp.eq.s32.totalorder %s195_s11, 1 }
   0x8   : > { %s361_s15 = scalar_select %p45_p1, %s306_s8, %s47_s13  }
   0x9   : > { %p363_p5 = por %p58_p2, %p57_p0  ;;  %p367_p6 = por %p64_p4, %p63_p3 }
   0xa   : > { %p198_p7 = scmp.ge.s32.totalorder %s310_s9, 1  ;;  %p89_p8 = scmp.lt.s32.totalorder %s310_s9, 3 }
   0xc   : > { %p90_p9 = pnand %p198_p7, %p89_p8 }
   0xd   : > { %p108_p10 = scmp.lt.s32.totalorder (!%p90_p9), %s346_s10, 1  ;;  %v312_v0 = vmov (!%p90_p9), 0   ;;  %s105_s23 = sand.u32 (!%p90_p9), 1, %s302_s7   ;;  %v113_v2 = vlaneseq (!%p90_p9)  ;;  %v313_v5 = vmov (!%p90_p9), 0.0  }
   0xe   : > { %93 = sbr.rel (%p90_p9) target bundleno = 170 (0xaa), region = 24  ;;  %247 = vset.pattern.permute.xlu0 (!%p90_p9), %v312_v0  ;;  %s199_s24 = sshll.u32 (!%p90_p9), %s105_s23, 3 }
   0xf   : > { %v114_v3 = vand.u32 (!%p90_p9), 127, %v113_v2  ;;  %s203_s25 = sshll.u32 (!%p90_p9), %s346_s10, 7  ;;  %s107_s26 = scalar_lea.vmem (!%p90_p9), [#allocation2], %s199_s24 }
  0x10   : > { %s136_s27 = sshll.u32 (!%p90_p9), %s107_s26, 4  ;;  %s383_s30 = scalar_lea.hbm (!%p90_p9), %s426_s1, %s203_s25  ;;  %s385_s27 = int_to_ptr.vmem [resolvable:$true] %s136_s27 }
  0x11   : > { %s123_s2 = scalar_lea.sflag (!%p90_p9), [#allocation3], %s105_s23  ;;  %s248_s3 = scalar_lea.vmem (!%p90_p9), %s385_s27, 128 }
  0x12   : > { %p249_p11 = scmp.ne.s32.totalorder (!%p90_p9), %s385_s27, %s248_s3  ;;  %s314_s4 = smov (!%p90_p9), [#allocation2]  }
  0x13   : > { %s252_s5 = sshll.u32 (!%p90_p9), %s314_s4, 4  ;;  %s253_s5 = int_to_ptr.vmem [resolvable:$false] %s252_s5 }
  0x14   : > { %p250_p12 = pnand (!%p90_p9), %p249_p11, %p363_p5  ;;  %p255_p0 = scmp.lt.s32.totalorder (!%p90_p9), %s385_s27, %s253_s5 }
  0x15   : > { %s109_s18 = scalar_select %p108_p10, %s346_s10, 1 }
  0x16   : > { %p251_p13 = pneg %p250_p12  ;;  %s254_s10 = scalar_lea.vmem %s253_s5, 256 }
  0x17   : > { %s200_s19 = sshll.u32 %s109_s18, 3  ;;  %p256_p1 = scmp.lt.s32.totalorder %s254_s10, %s248_s3 }
  0x18   : > { %s111_s22 = scalar_lea.vmem %s425_s0, %s200_s19 }
  0x19   : > { %v112_v1 = vld [vmem:[%s111_s22] sm:$0xff]  ;;  %p257_p2 = por %p256_p1, %p255_p0 }
  0x1a   : > { %116 = vperm.xlu0 %247, %v112_v1  }
  0x1b   : > { %p258_p3 = pnand %p257_p2, %p251_p13 }
  0x99   : > { %v117_v4 = vpop.permute.xlu0 %116 }
  0x9a   : > { %vm118_vm0 = vcmp.eq.s32.totalorder %v114_v3, %v117_v4 }
  0x9b   : > { %v201_v6 = vsel %vm118_vm0, 1.0, %v313_v5 }
  0x9c   : > { %121 = vst [vmem:[%s107_s26] sm:$0xff] %v201_v6 }
  0x9d   : > { %261 = shalt.err (!%p258_p3)
}
  0x9e   : > { %s262_s11 = scalar_lea.hbm %s383_s30, 128  ;;  %s266_s18 = scalar_lea.hbm %s426_s1, 256 }
  0x9f   : > { %p263_p4 = scmp.ne.s32.totalorder %s383_s30, %s262_s11  ;;  %p267_p9 = scmp.lt.u32.totalorder %s383_s30, %s426_s1 }
  0xa0   : > { %p268_p10 = scmp.lt.u32.totalorder %s266_s18, %s262_s11  ;;  %p270_p12 = scmp.lt.u32.totalorder %s262_s11, %s383_s30 }
  0xa1   : > { %p264_p7 = pnand %p263_p4, %p363_p5 }
  0xa2   : > { %p269_p11 = por %p268_p10, %p267_p9 }
  0xa3   : > { %p265_p8 = pneg %p264_p7 }
  0xa4   : > { %p271_p13 = por %p270_p12, %p269_p11 }
  0xa6   : > { %p272_p0 = pnand %p271_p13, %p265_p8 }
  0xa8   : > { %275 = shalt.err (!%p272_p0)
}
  0xa9   : > { %206 = dma.vmem_to_hbm [thread:$0]  (%p363_p5), %s385_s27, 128, %s383_s30, %s123_s2  }
  0xaa PF: > { %p212_p1 = scmp.ge.s32.totalorder %s310_s9, 2  ;;  %s148_s21 = sand.u32 1, %s298_s6  }
  0xab   : > { %s149_s22 = scalar_lea.sflag [#allocation3], %s148_s21 }
  0xac   : > { %p209_p2 = pnand %p212_p1, %p367_p6 }
  0xae   : > { %293 = dma.done.wait (!%p209_p2), %s149_s22, 128  }
  0xaf   : > { %295 = vsyncadd (!%p209_p2), %s149_s22, 4294967168  ;;  %p11_p3 = scmp.ge.s32.totalorder %s350_s12, 4   ;;  %s429_s6 = smov %s302_s7 }
  0xb0   : > { %s430_s7 = smov %s306_s8  ;;  %s431_s8 = smov %s361_s15 }
  0xb1   : > { %s432_s9 = smov %s350_s12  ;;  %13 = sbr.rel (!%p11_p3) target bundleno = 3 (0x3), region = 59 }
  0xb8   :  { %154 = vsyncpa [#allocation3], 1 }
  0xb9   :  { %156 = vsyncpa [#allocation3 + $0x1], 1 }

</bundles_post_ra>
